<compile_context>
chip_gen: v7x
topology: tpu7x:2x2x1
jax: 0.10.0
libtpu: 0.0.40
codegen_flags: <defaults>
</compile_context>

<pallas_src>
import functools

import numpy as np
import jax
import jax.numpy as jnp
from jax.experimental import pallas as pl
from jax.experimental.pallas import tpu as pltpu


# ----------------------------- Pallas kernels ---------------------------------

def ms_conv_toeplitz_kernel(x_ref, w_ref, o_ref, *, k_b, rows_in, rows_out):
    """Block-Toeplitz path: one banded matmul per batch element.

    x_ref : (k_b*T*C,     hw)  input block,  row = bb*T*C   + t*C    + c
    w_ref : (T*C_out,    T*C)  banded fused weight (temporal pad folded into zeros)
    o_ref : (k_b*T*C_out, hw)  output block, row = bb*T*C_out + t*C_out + o
    """
    w = w_ref[...]                       # hoisted; loaded once per grid step
    for b in range(k_b):                 # k_b is small (<= 4); results stored immediately
        xb = x_ref[b * rows_in:(b + 1) * rows_in, :]
        yb = jnp.dot(w, xb, preferred_element_type=jnp.float32)
        o_ref[b * rows_out:(b + 1) * rows_out, :] = yb.astype(o_ref.dtype)


def ms_conv_frames_kernel(x_ref, wf_ref, o_ref, *, k_b, T, C, C_out):
    """Per-frame path for large C_out: scratch-free, K trimmed at the temporal edges.

    x_ref : (k_b*T*C,     hw)
    wf_ref: (C_out,      7*C)  fused weight, column = j*C + c  (j = temporal tap 0..6)
    o_ref : (k_b*T*C_out, hw)
    """
    # TODO(synk): if C is not a multiple of 128 the lane slices of wf_ref below are
    #             unaligned (correct but slower); the Toeplitz path is preferred then.
    for b in range(k_b):
        xb = b * T * C
        ob = b * T * C_out
        for t in range(T):               # static unroll; each result is stored immediately
            j0 = max(0, 3 - t)
            j1 = min(6, T + 2 - t)
            s0 = t + j0 - 3
            n = j1 - j0 + 1
            w_t = wf_ref[:, j0 * C:(j0 + n) * C]                        # (C_out, n*C)
            win = x_ref[xb + s0 * C:xb + (s0 + n) * C, :]               # (n*C, hw)
            yt = jnp.dot(w_t, win, preferred_element_type=jnp.float32)  # (C_out, hw)
            o_ref[ob + t * C_out:ob + (t + 1) * C_out, :] = yt.astype(o_ref.dtype)


# ------------------------------- tiling helpers --------------------------------

def _vmem_capacity_bytes():
    try:
        info = pltpu.get_tpu_info()
        for name in ("vmem_capacity_bytes", "vmem_size_bytes", "vmem_bytes"):
            v = getattr(info, name, None)
            if v:
                return int(v)
    except Exception:
        pass
    return 64 * 2 ** 20  # conservative default (v7x per-TC VMEM)


def _pick_hw_block(HW_pad, per_lane_bytes, budget_bytes):
    """Largest lane tile (multiple of 128 dividing HW_pad) fitting the budget."""
    candidates = sorted({HW_pad, 8192, 4096, 2048, 1024, 512, 256, 128}, reverse=True)
    for blk in candidates:
        if blk <= HW_pad and HW_pad % blk == 0 and per_lane_bytes * blk <= budget_bytes:
            return blk
    return 128


def _pick_tiling(nb, T, C, C_out, HW_pad, itemsize, w_bytes):
    vmem_cap = _vmem_capacity_bytes()
    small_vmem = vmem_cap <= 80 * 2 ** 20          # v7x: 64 MiB / TensorCore
    budget = (20 if small_vmem else 36) * 2 ** 20  # per-step working-set budget
    limit_cap = (48 if small_vmem else 96) * 2 ** 20
    io_budget = max(budget - 2 * w_bytes, 2 * 2 ** 20)
    per_lane = 2 * T * (C + C_out) * itemsize      # double-buffered in+out rows, k_b = 1
    hw_blk = _pick_hw_block(HW_pad, per_lane, io_budget)
    k_b = 1
    if hw_blk < 512 and nb > 1:                    # amortize the ~0.35 us per-step overhead
        k_b = min(max(1, 512 // hw_blk), max(1, nb // 2))
        while k_b > 1 and (nb % k_b != 0 or per_lane * k_b * hw_blk > io_budget):
            k_b -= 1
    vmem_need = per_lane * k_b * hw_blk + 2 * w_bytes
    vmem_limit = int(min(max(int(1.5 * vmem_need), 32 * 2 ** 20), limit_cap))
    return hw_blk, k_b, vmem_limit


# --------------------------------- wrapper --------------------------------------

def ms_group_conv1d_net(x_nchw, wf7, n_segment=8):
    """Fused MsGroupConv1d + 1x1-conv `net`.

    x_nchw : (NT, C, H, W), NT = n_batch * n_segment (PyTorch NCHW layout)
    wf7    : (C_out, 7, C) numpy f32, wf7[o, j, c] = w_net[o, c] * w_temporal[c, j]
    """
    NT, C, H, W = x_nchw.shape
    assert NT % n_segment == 0, "batch dim must be n_batch * n_segment"
    T = n_segment
    nb = NT // T
    C_out = wf7.shape[0]
    assert wf7.shape == (C_out, 7, C)

    dtype = x_nchw.dtype
    itemsize = jnp.dtype(dtype).itemsize
    sub_align = 8 * (4 // itemsize)          # 8 rows f32, 16 rows bf16, 32 rows int8
    HW = H * W
    HW_pad = -(-HW // 128) * 128             # lane-dense padded extent

    # Path selection: banded block-Toeplitz matmul for small C_out (fills MXU rows),
    # scratch-free per-frame matmuls when C_out is already MXU-sized.
    toeplitz_bytes = (T * C_out) * (T * C) * itemsize
    use_toeplitz = ((C_out < 128) or (C % 128 != 0)) and (toeplitz_bytes <= 8 * 2 ** 20)

    if use_toeplitz:
        assert (T * C) % sub_align == 0 and (T * C_out) % sub_align == 0, \
            "T*C and T*C_out must be sublane-aligned for this dtype"
        w_mat = np.zeros((T * C_out, T * C), np.float32)
        for t in range(T):
            for s in range(max(0, t - 3), min(T, t + 4)):
                w_mat[t * C_out:(t + 1) * C_out, s * C:(s + 1) * C] = wf7[:, s - t + 3, :]
        kernel = functools.partial(ms_conv_toeplitz_kernel,
                                   rows_in=T * C, rows_out=T * C_out)
    else:
        assert C % sub_align == 0 and C_out % sub_align == 0, \
            "C and C_out must be sublane-aligned for this dtype"
        w_mat = np.ascontiguousarray(wf7.reshape(C_out, 7 * C))
        kernel = functools.partial(ms_conv_frames_kernel, T=T, C=C, C_out=C_out)

    rows_w, cols_w = w_mat.shape
    w_bytes = rows_w * cols_w * itemsize
    hw_blk, k_b, vmem_limit = _pick_tiling(nb, T, C, C_out, HW_pad, itemsize, w_bytes)
    n_hw = HW_pad // hw_blk
    kernel = functools.partial(kernel, k_b=k_b)

    # Free contiguous reshape; lane pad only when HW is not a multiple of 128.
    x2 = x_nchw.reshape(NT * C, HW)
    if HW_pad != HW:
        x2 = jnp.pad(x2, ((0, 0), (0, HW_pad - HW)))
    w_dev = jnp.asarray(w_mat, dtype=dtype)

    flops = 2 * NT * HW_pad * C_out * 7 * C
    bytes_accessed = (NT * C * HW_pad + NT * C_out * HW_pad) * itemsize + w_bytes

    out2 = pl.pallas_call(
        kernel,
        out_shape=jax.ShapeDtypeStruct((NT * C_out, HW_pad), dtype),
        grid_spec=pltpu.PrefetchScalarGridSpec(
            num_scalar_prefetch=0,
            grid=(nb // k_b, n_hw),
            in_specs=[
                pl.BlockSpec((k_b * T * C, hw_blk), lambda b, w: (b, w)),
                pl.BlockSpec((rows_w, cols_w), lambda b, w: (0, 0)),
            ],
            out_specs=pl.BlockSpec((k_b * T * C_out, hw_blk), lambda b, w: (b, w)),
        ),
        compiler_params=pltpu.CompilerParams(
            dimension_semantics=("parallel", "parallel"),
            vmem_limit_bytes=vmem_limit,
        ),
        cost_estimate=pl.CostEstimate(
            flops=flops, transcendentals=0, bytes_accessed=bytes_accessed),
    )(x2, w_dev)

    if HW_pad != HW:
        out2 = out2[:, :HW]
    return out2.reshape(NT, C_out, H, W)


# --------------------- parameters: exact MsGroupConv1d.weight_init ------------

def make_branch_weights(C, n_div=4):
    """Per-branch temporal kernels exactly as MsGroupConv1d.weight_init.
    Shapes (planes, k), k in (1,3,5,7), planes = C // 4, fold = planes // n_div."""
    planes = C // 4
    fold = planes // n_div
    w1 = np.zeros((planes, 1), np.float32); w1[:, 0] = 1.0
    w3 = np.zeros((planes, 3), np.float32)
    w3[:fold, 0] = 1.0; w3[fold:2 * fold, 2] = 1.0; w3[2 * fold:, 1] = 1.0
    w5 = np.zeros((planes, 5), np.float32)
    w5[:fold, :2] = 1.0; w5[fold:2 * fold, 3:] = 1.0; w5[2 * fold:, 2] = 1.0
    w7 = np.zeros((planes, 7), np.float32)
    w7[:fold, :3] = 1.0; w7[fold:2 * fold, 4:] = 1.0; w7[2 * fold:, 3] = 1.0
    return w1, w3, w5, w7


def fuse_weights_7(branch_ws, w_net):
    """(C_out, 7, C) fused tensor: wf7[o, j, c] = w_net[o, c] * w_temporal[c, j],
    each width-k kernel centered in a width-7 window (identical 'same' semantics)."""
    cols = []
    for wk in branch_ws:
        k = wk.shape[1]
        p = (7 - k) // 2
        cols.append(np.pad(wk, ((0, 0), (p, p))))
    w_temporal = np.concatenate(cols, axis=0).astype(np.float32)      # (C, 7)
    w_net = np.asarray(w_net, np.float32)                             # (C_out, C)
    return w_net[:, None, :] * w_temporal.T[None, :, :]               # (C_out, 7, C)


# ------------------------------ reference (numpy) ------------------------------

def reference(x_nchw, branch_ws, w_net, n_segment):
    """Pure-numpy float64 mirror of MsGroupConv1d.forward (net := bias-free 1x1 conv)."""
    x = np.asarray(x_nchw, np.float64)
    NT, C, H, W = x.shape
    nb = NT // n_segment
    planes = C // 4
    xv = x.reshape(nb, n_segment, C, H, W).transpose(0, 2, 1, 3, 4)   # (nb,C,T,H,W)
    y = np.zeros_like(xv)
    for gi, wk in enumerate(branch_ws):
        k = wk.shape[1]
        pad = k // 2
        xg = xv[:, gi * planes:(gi + 1) * planes]
        xp = np.pad(xg, ((0, 0), (0, 0), (pad, pad), (0, 0), (0, 0)))
        acc = np.zeros_like(xg)
        for j in range(k):
            acc += wk[:, j].astype(np.float64)[None, :, None, None, None] \
                   * xp[:, :, j:j + n_segment]
        y[:, gi * planes:(gi + 1) * planes] = acc
    y = y.transpose(0, 2, 1, 3, 4).reshape(NT, C, H, W)
    return np.einsum('oc,nchw->nohw', np.asarray(w_net, np.float64), y)


# ----------------------------------- main --------------------------------------

if __name__ == "__main__":
    n_segment = 8
    n_div = 4
    key = jax.random.PRNGKey(0)

    # --- Test A: main config (f32, block-Toeplitz path) ------------------------
    n_batch, C, H, W = 2, 16, 16, 16
    NT = n_batch * n_segment
    kx, kw, key = jax.random.split(key, 3)
    x = jax.random.normal(kx, (NT, C, H, W), dtype=jnp.float32)
    branch_ws = make_branch_weights(C, n_div=n_div)
    w_net = np.asarray(jax.random.normal(kw, (C, C), dtype=jnp.float32)) * 0.1
    wf7 = fuse_weights_7(branch_ws, w_net)

    out = jax.block_until_ready(ms_group_conv1d_net(x, wf7, n_segment=n_segment))
    ref = reference(np.asarray(x), branch_ws, w_net, n_segment)
    assert out.shape == (NT, C, H, W)
    np.testing.assert_allclose(np.asarray(out), ref.astype(np.float32),
                               rtol=1e-4, atol=1e-4)

    # --- Test B: bf16 I/O (f32 accumulation), compared to bf16-quantized ref ---
    x_bf = x.astype(jnp.bfloat16)
    out_bf = jax.block_until_ready(ms_group_conv1d_net(x_bf, wf7, n_segment=n_segment))
    x_q = np.asarray(x_bf.astype(jnp.float32))
    w_net_q = np.asarray(jnp.asarray(w_net).astype(jnp.bfloat16).astype(jnp.float32))
    ref_bf = reference(x_q, branch_ws, w_net_q, n_segment)
    np.testing.assert_allclose(np.asarray(out_bf.astype(jnp.float32)),
                               ref_bf.astype(np.float32), rtol=2e-2, atol=2e-2)

    # --- Test C: HW not a multiple of 128 (lane pad) + batch folding -----------
    n_batch_c, C_c, H_c, W_c = 4, 16, 9, 9
    NT_c = n_batch_c * n_segment
    kx2, kw2, key = jax.random.split(key, 3)
    x_c = jax.random.normal(kx2, (NT_c, C_c, H_c, W_c), dtype=jnp.float32)
    branch_ws_c = make_branch_weights(C_c, n_div=n_div)
    w_net_c = np.asarray(jax.random.normal(kw2, (C_c, C_c), dtype=jnp.float32)) * 0.1
    wf7_c = fuse_weights_7(branch_ws_c, w_net_c)
    out_c = jax.block_until_ready(ms_group_conv1d_net(x_c, wf7_c, n_segment=n_segment))
    ref_c = reference(np.asarray(x_c), branch_ws_c, w_net_c, n_segment)
    np.testing.assert_allclose(np.asarray(out_c), ref_c.astype(np.float32),
                               rtol=1e-4, atol=1e-4)

    # --- Test D: large C_out (per-frame, scratch-free, edge-trimmed K) ---------
    n_batch_d, C_d, H_d, W_d = 1, 128, 16, 16
    NT_d = n_batch_d * n_segment
    kx3, kw3, key = jax.random.split(key, 3)
    x_d = jax.random.normal(kx3, (NT_d, C_d, H_d, W_d), dtype=jnp.float32)
    branch_ws_d = make_branch_weights(C_d, n_div=n_div)
    w_net_d = np.asarray(jax.random.normal(kw3, (C_d, C_d), dtype=jnp.float32)) * 0.1
    wf7_d = fuse_weights_7(branch_ws_d, w_net_d)
    out_d = jax.block_until_ready(ms_group_conv1d_net(x_d, wf7_d, n_segment=n_segment))
    ref_d = reference(np.asarray(x_d), branch_ws_d, w_net_d, n_segment)
    np.testing.assert_allclose(np.asarray(out_d), ref_d.astype(np.float32),
                               rtol=2e-4, atol=5e-4)

    print("KERNEL_OK")
</pallas_src>

<mosaic_0001>
module attributes {stable_mosaic.version = 11 : i64} {
  func.func @ms_conv_toeplitz_kernel(%arg0: i32, %arg1: i32, %arg2: memref<128x256xf32, #tpu.memory_space<vmem>>, %arg3: memref<128x128xf32, #tpu.memory_space<vmem>>, %arg4: memref<128x256xf32, #tpu.memory_space<vmem>>) attributes {dimension_semantics = [#tpu.dimension_semantics<parallel>, #tpu.dimension_semantics<parallel>], iteration_bounds = array<i64: 2, 1>, scalar_prefetch = 0 : i64, scratch_operands = 0 : i64, tpu.core_type = #tpu.core_type<tc>, window_params = [{transform_indices = @transform_0, window_bounds = array<i64: 128, 256>}, {pipeline_mode = #tpu.pipeline_mode<synchronous>, transform_indices = @transform_1, window_bounds = array<i64: 128, 128>}, {transform_indices = @transform_2, window_bounds = array<i64: 128, 256>}]} {
    %c0 = arith.constant 0 : index
    %c0_0 = arith.constant 0 : index
    %0 = vector.load %arg3[%c0, %c0_0] : memref<128x128xf32, #tpu.memory_space<vmem>>, vector<128x128xf32>
    %c0_1 = arith.constant 0 : index
    %c0_2 = arith.constant 0 : index
    %1 = vector.load %arg2[%c0_1, %c0_2] : memref<128x256xf32, #tpu.memory_space<vmem>>, vector<128x256xf32>
    %cst = arith.constant dense<0.000000e+00> : vector<128x256xf32>
    %2 = tpu.matmul %0, %1, %cst {dimension_numbers = #tpu.dot_dimension_numbers<[1], [0], [0], [1], [0, 0, 1, 1], [], []>} : vector<128x128xf32>, vector<128x256xf32>, vector<128x256xf32> -> vector<128x256xf32>
    %c0_3 = arith.constant 0 : index
    %c0_4 = arith.constant 0 : index
    %3 = vector.load %arg4[%c0_3, %c0_4] : memref<128x256xf32, #tpu.memory_space<vmem>>, vector<128x256xf32>
    tpu.vector_store %arg4[%c0_3, %c0_4], %2 {strides = array<i32>} : memref<128x256xf32, #tpu.memory_space<vmem>>, vector<128x256xf32>,
    return
  }
  func.func @transform_0(%arg0: i32, %arg1: i32) -> (i32, i32) {
    %c0_i32 = arith.constant 0 : i32
    return %arg0, %arg1 : i32, i32
  }
  func.func @transform_1(%arg0: i32, %arg1: i32) -> (i32, i32) {
    %c0_i32 = arith.constant 0 : i32
    %c0_i32_0 = arith.constant 0 : i32
    %c0_i32_1 = arith.constant 0 : i32
    return %c0_i32, %c0_i32_0 : i32, i32
  }
  func.func @transform_2(%arg0: i32, %arg1: i32) -> (i32, i32) {
    %c0_i32 = arith.constant 0 : i32
    return %arg0, %arg1 : i32, i32
  }
}

</mosaic_0001>

<bundles_post_ra>
// kernel: tpu_custom_call.1
= control target key start
LH: loop header
LB: loop body
LE: loop exit
PB: predicated region body
PF: predicated region fallthrough
CT: control target
= control target key end

     0   :  { %7 = vsyncpa [#allocation3], 0  ;;  %s1185_s0 = inlined_call_operand.hbm [shape: f32[256,256], index: 0, kind: input, shape index: {}]   ;;  %s1186_s1 = inlined_call_operand.hbm [shape: f32[128,128], index: 1, kind: input, shape index: {}]   ;;  %s1187_s2 = inlined_call_operand.hbm [shape: f32[256,256], index: 2, kind: output, shape index: {}]  }
   0x1   :  { %9 = vsyncpa [#allocation3 + $0x1], 0 }
   0x2   :  { %10 = vsyncpa [#allocation6], 0 }
   0x3   :  { %11 = vsyncpa [#allocation4], 0 }
   0x4   :  { %13 = vsyncpa [#allocation4 + $0x1], 0  ;;  %s877_s9 = smov 0   ;;  %s879_s10 = smov 0  }
   0x5   :  { %s881_s11 = smov 0   ;;  %s883_s12 = smov 0  }
   0x6   :  { %s885_s13 = smov 0   ;;  %s887_s14 = smov 0  }
   0x7 LB: > { %s555_s15 = sadd.s32 4294967295, %s850_s14   ;;  %s556_s16 = sadd.s32 4294967294, %s850_s14   ;;  %s850_s14 = sphi %s887_s14, %s19_s14   ;;  %s846_s13 = sphi %s885_s13, %s1211_s13   ;;  %s842_s12 = sphi %s883_s12, %s1210_s12   ;;  %s838_s11 = sphi %s881_s11, %s1209_s11   ;;  %s834_s10 = sphi %s879_s10, %s1208_s10   ;;  %s830_s9 = sphi %s877_s9, %s1207_s9  }
   0x8   : > { %p53_p0 = scmp.ne.s32.totalorder %s834_s10, %s830_s9  ;;  %p911_p1 = scmp.eq.s32.totalorder %s555_s15, 0 }
   0x9   : > { %p915_p2 = scmp.eq.s32.totalorder %s555_s15, 1  ;;  %p106_p3 = scmp.eq.s32.totalorder %s556_s16, 1 }
   0xa   : > { %s1192_s17 = scalar_select %p911_p1, 1, 0 }
   0xb   : > { %s1193_s18 = scalar_select %p915_p2, 1, 0 }
   0xc   : > { %p921_p4 = por %p911_p1, %p53_p0  ;;  %p557_p5 = scmp.ge.s32.totalorder %s850_s14, 1 }
   0xd   : > { %p926_p6 = por %p106_p3, %p53_p0  ;;  %p113_p7 = scmp.lt.s32.totalorder %s850_s14, 3 }
   0xe   : > { %s1194_s19 = scalar_select %p921_p4, 1, 0 }
   0xf   : > { %s1195_s20 = scalar_select %p926_p6, 1, 0 }
  0x10   : > { %p931_p8 = pnand %p557_p5, %p113_p7  ;;  %s852_s22 = smov [#allocation5]  }
  0x11   : > { %s125_s23 = sshll.u32 %s852_s22, 4  ;;  %s31_s25 = sadd.s32 1, %s846_s13  ;;  %s126_s23 = int_to_ptr.vmem [resolvable:$true] %s125_s23 }
  0x12   : > { %s1196_s21 = scalar_select %p931_p8, 1, 0 }
  0x13   : > { %p634_p9 = pneg %p931_p8  ;;  %s706_s28 = scalar_lea.hbm %s1186_s1, 2048 }
  0x14   : > { %p707_p12 = scmp.ne.s32.totalorder %s1186_s1, %s706_s28  ;;  %p713_p5 = scmp.lt.u32.totalorder %s706_s28, %s1186_s1 }
  0x15   : > { %p940_p11 = pnand %p634_p9, %p911_p1 }
  0x17   : > { %p708_p13 = pneg %p940_p11 }
  0x19   : > { %p709_p0 = pnand %p708_p13, %p707_p12 }
  0x1b   : > { %p710_p3 = pneg %p709_p0 }
  0x1d   : > { %p715_p7 = pnand %p713_p5, %p710_p3 }
  0x1f   : > { %718 = shalt.err (!%p715_p7)
}
  0x20   : > { %s719_s5 = scalar_lea.vmem %s126_s23, 2048  ;;  %p727_p1 = scmp.lt.s32.totalorder %s126_s23, %s126_s23 }
  0x21   : > { %p720_p9 = scmp.ne.s32.totalorder %s126_s23, %s719_s5  ;;  %p728_p4 = scmp.lt.s32.totalorder %s719_s5, %s719_s5 }
  0x23   : > { %p722_p10 = pnand %p720_p9, %p708_p13  ;;  %p729_p8 = por %p728_p4, %p727_p1 }
  0x25   : > { %p723_p6 = pneg %p722_p10 }
  0x27   : > { %p730_p2 = pnand %p729_p8, %p723_p6 }
  0x29   : > { %733 = shalt.err (!%p730_p2)
}
  0x2a   : > { %s853_s6 = smov 128   ;;  %s854_s7 = smov 8  }
  0x2b   : > { %637 = dma.hbm_to_vmem [thread:$0]  (!%p940_p11), %s1186_s1, 2048, %s126_s23, [#allocation6], %s853_s6, %s853_s6, %s854_s7  }
  0x2c   : > { %p33_p1 = scmp.ge.s32.totalorder %s31_s25, 2  ;;  %s40_s16 = sadd.s32 1, %s838_s11 }
  0x2d   : > { %p47_p2 = scmp.ne.s32.totalorder %s838_s11, %s834_s10  ;;  %p48_p4 = scmp.eq.s32.totalorder %s850_s14, 0 }
  0x2e   : > { %s1213_s25 = smov (%p33_p1, %s31_s25), 0  ;;  %p1199_p8 = scmp.ne.s32.totalorder %s1193_s18, 0 }
  0x2f   : > { %p967_p6 = por %p48_p4, %p47_p2  ;;  %s35_s24 = ssub.s32 %s846_s13, %s1213_s25 }
  0x30   : > { %p973_p10 = por %p1199_p8, %p47_p2  ;;  %p647_p12 = scmp.lt.s32.totalorder %s850_s14, 2 }
  0x31   : > { %p38_p11 = scmp.eq.s32.totalorder %s35_s24, 0  ;;  %s139_s23 = sand.u32 1, %s838_s11  }
  0x32   : > { %s560_s27 = sshll.u32 %s139_s23, 8  ;;  %s575_s29 = sshll.u32 %s846_s13, 12 }
  0x33   : > { %s982_s28 = scalar_select %p38_p11, %s838_s11, %s40_s16  }
  0x34   : > { %s988_s4 = scalar_lea.hbm %s1185_s0, %s575_s29  ;;  %s143_s18 = scalar_lea.vmem [#allocation2], %s560_s27 }
  0x35   : > { %s153_s5 = sshll.u32 %s143_s18, 4  ;;  %p994_p13 = pnand %p647_p12, %p967_p6  ;;  %s990_s5 = int_to_ptr.vmem [resolvable:$true] %s153_s5 }
  0x36   : > { %s998_s7 = scalar_lea.sflag [#allocation3], %s139_s23  ;;  %s734_s8 = scalar_lea.hbm %s988_s4, 4096 }
  0x37   : > { %p735_p0 = scmp.ne.s32.totalorder %s988_s4, %s734_s8  ;;  %p736_p3 = pneg %p994_p13 }
  0x38   : > { %s739_s22 = scalar_lea.hbm %s1185_s0, 8192  ;;  %p740_p9 = scmp.lt.u32.totalorder %s988_s4, %s1185_s0 }
  0x39   : > { %p737_p5 = pnand %p736_p3, %p735_p0  ;;  %p741_p1 = scmp.lt.u32.totalorder %s739_s22, %s734_s8 }
  0x3a   : > { %p743_p4 = scmp.lt.u32.totalorder %s734_s8, %s988_s4 }
  0x3b   : > { %p738_p7 = pneg %p737_p5  ;;  %p742_p2 = por %p741_p1, %p740_p9 }
  0x3d   : > { %p744_p6 = por %p743_p4, %p742_p2 }
  0x3f   : > { %p745_p8 = pnand %p744_p6, %p738_p7 }
  0x41   : > { %748 = shalt.err (!%p745_p8)
}
  0x42   : > { %s749_s23 = scalar_lea.vmem %s990_s5, 4096  ;;  %s855_s29 = smov [#allocation2]  }
  0x43   : > { %p750_p12 = scmp.ne.s32.totalorder %s990_s5, %s749_s23  ;;  %s754_s30 = sshll.u32 %s855_s29, 4  ;;  %s755_s30 = int_to_ptr.vmem [resolvable:$false] %s754_s30 }
  0x44   : > { %s756_s3 = scalar_lea.vmem %s755_s30, 8192  ;;  %p757_p5 = scmp.lt.s32.totalorder %s990_s5, %s755_s30 }
  0x45   : > { %p752_p11 = pnand %p750_p12, %p736_p3  ;;  %p758_p9 = scmp.lt.s32.totalorder %s756_s3, %s749_s23 }
  0x47   : > { %p753_p0 = pneg %p752_p11  ;;  %p759_p1 = por %p758_p9, %p757_p5 }
  0x49   : > { %p760_p2 = pnand %p759_p1, %p753_p0 }
  0x4b   : > { %763 = shalt.err (!%p760_p2)
}
  0x4c   : > { %s856_s18 = smov 256   ;;  %s857_s8 = smov 16  }
  0x4d   : > { %641 = dma.hbm_to_vmem [thread:$0]  (!%p994_p13), %s988_s4, 4096, %s990_s5, %s998_s7, %s856_s18, %s856_s18, %s857_s8  }
  0x4e   : > { %p1202_p3 = scmp.ne.s32.totalorder %s1196_s21, 0 }
  0x4f   : > { %s1029_s15 = sand.u32 (!%p1202_p3), 1, %s834_s10   ;;  %p1203_p7 = scmp.ne.s32.totalorder (!%p1202_p3), %s1194_s19, 0 }
  0x50   : > { %165 = sbr.rel (%p1202_p3) target bundleno = 382 (0x17e), region = 28  ;;  %s565_s16 = sshll.u32 (!%p1202_p3), %s1029_s15, 8 }
  0x51   : > { %s168_s22 = scalar_lea.sflag (!%p1202_p3), [#allocation3], %s1029_s15  ;;  %s1035_s24 = scalar_lea.vmem (!%p1202_p3), [#allocation2], %s565_s16 }
  0x57   : > { %817 = dma.done.wait (%p1203_p7), %s168_s22, 4096  }
  0x58   : > { %819 = vsyncadd (%p1203_p7), %s168_s22, 4294963200  ;;  %p1204_p13 = scmp.ne.s32.totalorder %s1192_s17, 0 }
  0x5a   : > { %821 = dma.done.wait (%p1204_p13), [#allocation6], 2048  }
  0x5b   : > { %823 = vsyncadd (%p1204_p13), [#allocation6], 4294965248  ;;  %v858_v0 = vmov 0.0   ;;  %v217_v1 = vld [vmem:[%s1035_s24 + $0x8] sm:$0xff]  ;;  %v219_v2 = vld [vmem:[%s1035_s24 + $0x18] sm:$0xff]  ;;  %s1095_s17 = scalar_lea.vmem [#allocation7], %s565_s16 }
  0x5c   : > { %312 = vmatprep.mubr.f32.mxu0 %v858_v0  ;;  %360 = vmatprep.mubr.f32.mxu1 %v858_v0  ;;  %v216_v3 = vld [vmem:[%s1035_s24] sm:$0xff]  ;;  %v578_v4 = vpack.c.bf16 %v219_v2, %v217_v1  ;;  %v218_v5 = vld [vmem:[%s1035_s24 + $0x10] sm:$0xff]  ;;  %v221_v6 = vld [vmem:[%s1035_s24 + $0x28] sm:$0xff]  ;;  %s577_s19 = sshll.u32 %s842_s12, 12  ;;  %s458_s21 = sshll.u32 %s1095_s17, 4  ;;  %s1132_s21 = int_to_ptr.vmem [resolvable:$true] %s458_s21 }
  0x5d   : > { %v223_v7 = vld [vmem:[%s1035_s24 + $0x38] sm:$0xff]  ;;  %v580_v8 = vpack.c.bf16 %v218_v5, %v216_v3  ;;  %v220_v10 = vld [vmem:[%s1035_s24 + $0x20] sm:$0xff]  ;;  %v222_v11 = vld [vmem:[%s1035_s24 + $0x30] sm:$0xff]  ;;  %s1130_s6 = scalar_lea.hbm %s1187_s2, %s577_s19  ;;  %s442_s12 = scalar_lea.sflag [#allocation4], %s1029_s15 }
  0x5e   : > { %v582_v9 = vpack.c.bf16 %v223_v7, %v221_v6  ;;  %v225_v12 = vld [vmem:[%s1035_s24 + $0x48] sm:$0xff]  ;;  %579 = vmatprep.subr.bf16.mxu0 %v578_v4  ;;  %610 = vmatprep.subr.bf16.mxu1 %v578_v4  ;;  %v227_v13 = vld [vmem:[%s1035_s24 + $0x58] sm:$0xff]  ;;  %v584_v14 = vpack.c.bf16 %v222_v11, %v220_v10  ;;  %v224_v16 = vld [vmem:[%s1035_s24 + $0x40] sm:$0xff]  ;;  %s764_s7 = scalar_lea.vmem %s1132_s21, 4096  ;;  %s859_s27 = smov [#allocation7]  }
  0x5f   : > { %581 = vmatpush1.bf16.msra.mxu0 %v580_v8  ;;  %618 = vmatpush1.bf16.msra.mxu1 %v580_v8  ;;  %v586_v15 = vpack.c.bf16 %v227_v13, %v225_v12  ;;  %v226_v17 = vld [vmem:[%s1035_s24 + $0x50] sm:$0xff]  ;;  %v229_v18 = vld [vmem:[%s1035_s24 + $0x68] sm:$0xff]  ;;  %v231_v19 = vld [vmem:[%s1035_s24 + $0x78] sm:$0xff]  ;;  %p765_p4 = scmp.ne.s32.totalorder %s1132_s21, %s764_s7  ;;  %s768_s23 = sshll.u32 %s859_s27, 4  ;;  %s769_s23 = int_to_ptr.vmem [resolvable:$false] %s768_s23 }
  0x60   : > { %583 = vmatprep.subr.bf16.mxu0 %v582_v9  ;;  %611 = vmatprep.subr.bf16.mxu1 %v582_v9  ;;  %v588_v20 = vpack.c.bf16 %v226_v17, %v224_v16  ;;  %v590_v21 = vpack.c.bf16 %v231_v19, %v229_v18  ;;  %v228_v22 = vld [vmem:[%s1035_s24 + $0x60] sm:$0xff]  ;;  %v230_v23 = vld [vmem:[%s1035_s24 + $0x70] sm:$0xff]  ;;  %v233_v24 = vld [vmem:[%s1035_s24 + $0x88] sm:$0xff]  ;;  %s770_s29 = scalar_lea.vmem %s769_s23, 8192  ;;  %p771_p12 = scmp.lt.s32.totalorder %s1132_s21, %s769_s23 }
  0x61   : > { %v235_v25 = vld [vmem:[%s1035_s24 + $0x98] sm:$0xff]  ;;  %v592_v26 = vpack.c.bf16 %v230_v23, %v228_v22  ;;  %v232_v28 = vld [vmem:[%s1035_s24 + $0x80] sm:$0xff]  ;;  %v234_v29 = vld [vmem:[%s1035_s24 + $0x90] sm:$0xff]  ;;  %p766_p6 = pnand %p765_p4, %p973_p10  ;;  %p772_p11 = scmp.lt.s32.totalorder %s770_s29, %s764_s7 }
  0x62   : > { %v594_v27 = vpack.c.bf16 %v235_v25, %v233_v24  ;;  %v237_v30 = vld [vmem:[%s1035_s24 + $0xa8] sm:$0xff]  ;;  %v239_v31 = vld [vmem:[%s1035_s24 + $0xb8] sm:$0xff]  ;;  %v596_v32 = vpack.c.bf16 %v234_v29, %v232_v28  ;;  %v236_v34 = vld [vmem:[%s1035_s24 + $0xa0] sm:$0xff] }
  0x63   : > { %585 = vmatpush1.bf16.msra.mxu0 %v584_v14  ;;  %619 = vmatpush1.bf16.msra.mxu1 %v584_v14  ;;  %v598_v33 = vpack.c.bf16 %v239_v31, %v237_v30  ;;  %v238_v35 = vld [vmem:[%s1035_s24 + $0xb0] sm:$0xff]  ;;  %v241_v36 = vld [vmem:[%s1035_s24 + $0xc8] sm:$0xff]  ;;  %v243_v37 = vld [vmem:[%s1035_s24 + $0xd8] sm:$0xff]  ;;  %p767_p8 = pneg %p766_p6  ;;  %p773_p0 = por %p772_p11, %p771_p12 }
  0x64   : > { %587 = vmatprep.subr.bf16.mxu0 %v586_v15  ;;  %612 = vmatprep.subr.bf16.mxu1 %v586_v15  ;;  %v600_v38 = vpack.c.bf16 %v238_v35, %v236_v34  ;;  %v602_v39 = vpack.c.bf16 %v243_v37, %v241_v36  ;;  %v240_v40 = vld [vmem:[%s1035_s24 + $0xc0] sm:$0xff]  ;;  %v242_v41 = vld [vmem:[%s1035_s24 + $0xd0] sm:$0xff]  ;;  %v245_v42 = vld [vmem:[%s1035_s24 + $0xe8] sm:$0xff] }
  0x65   : > { %v247_v43 = vld [vmem:[%s1035_s24 + $0xf8] sm:$0xff]  ;;  %v604_v44 = vpack.c.bf16 %v242_v41, %v240_v40  ;;  %v244_v46 = vld [vmem:[%s1035_s24 + $0xe0] sm:$0xff]  ;;  %v246_v47 = vld [vmem:[%s1035_s24 + $0xf0] sm:$0xff]  ;;  %p774_p5 = pnand %p773_p0, %p767_p8 }
  0x66   : > { %v606_v45 = vpack.c.bf16 %v247_v43, %v245_v42  ;;  %v608_v48 = vpack.c.bf16 %v246_v47, %v244_v46  ;;  %v200_v49 = vld [vmem:[#allocation5] sm:$0xff]  ;;  %v201_v51 = vld [vmem:[#allocation5 + $0x8] sm:$0xff]  ;;  %v202_v53 = vld [vmem:[#allocation5 + $0x10] sm:$0xff] }
  0x67   : > { %589 = vmatpush1.bf16.msra.mxu0 %v588_v20  ;;  %620 = vmatpush1.bf16.msra.mxu1 %v588_v20  ;;  %v208_v50 = vld [vmem:[#allocation5 + $0x40] sm:$0xff]  ;;  %v209_v52 = vld [vmem:[#allocation5 + $0x48] sm:$0xff]  ;;  %v210_v54 = vld [vmem:[#allocation5 + $0x50] sm:$0xff] }
  0x68   : > { %591 = vmatprep.subr.bf16.mxu0 %v590_v21  ;;  %613 = vmatprep.subr.bf16.mxu1 %v590_v21  ;;  %v203_v55 = vld [vmem:[#allocation5 + $0x18] sm:$0xff]  ;;  %v204_v57 = vld [vmem:[#allocation5 + $0x20] sm:$0xff]  ;;  %v205_v59 = vld [vmem:[#allocation5 + $0x28] sm:$0xff] }
  0x69   : > { %v211_v56 = vld [vmem:[#allocation5 + $0x58] sm:$0xff]  ;;  %v212_v58 = vld [vmem:[#allocation5 + $0x60] sm:$0xff]  ;;  %v213_v60 = vld [vmem:[#allocation5 + $0x68] sm:$0xff] }
  0x6a   : > { %v206_v61 = vld [vmem:[#allocation5 + $0x30] sm:$0xff]  ;;  %v207_v63 = vld [vmem:[#allocation5 + $0x38] sm:$0xff] }
  0x6b   : > { %593 = vmatpush1.bf16.msra.mxu0 %v592_v26  ;;  %621 = vmatpush1.bf16.msra.mxu1 %v592_v26  ;;  %v214_v62 = vld [vmem:[#allocation5 + $0x70] sm:$0xff]  ;;  %v215_v1 = vld [vmem:[#allocation5 + $0x78] sm:$0xff] }
  0x6c   : > { %595 = vmatprep.subr.bf16.mxu0 %v594_v27  ;;  %614 = vmatprep.subr.bf16.mxu1 %v594_v27 }
  0x6f   : > { %597 = vmatpush1.bf16.msra.mxu0 %v596_v32  ;;  %622 = vmatpush1.bf16.msra.mxu1 %v596_v32 }
  0x70   : > { %599 = vmatprep.subr.bf16.mxu0 %v598_v33  ;;  %615 = vmatprep.subr.bf16.mxu1 %v598_v33 }
  0x73   : > { %601 = vmatpush1.bf16.msra.mxu0 %v600_v38  ;;  %623 = vmatpush1.bf16.msra.mxu1 %v600_v38 }
  0x74   : > { %603 = vmatprep.subr.bf16.mxu0 %v602_v39  ;;  %616 = vmatprep.subr.bf16.mxu1 %v602_v39 }
  0x77   : > { %605 = vmatpush1.bf16.msra.mxu0 %v604_v44  ;;  %624 = vmatpush1.bf16.msra.mxu1 %v604_v44 }
  0x78   : > { %607 = vmatprep.subr.bf16.mxu0 %v606_v45  ;;  %617 = vmatprep.subr.bf16.mxu1 %v606_v45 }
  0x7b   : > { %609 = vmatpush1.bf16.msra.mxu0 %v608_v48  ;;  %625 = vmatpush1.bf16.msra.mxu1 %v608_v48 }
  0x7e   : > { %313 = vmatmul.mubr.f32.vlgmr.msra.gmra.mrb[0].mxu0 %v200_v49  ;;  %361 = vmatmul.mubr.f32.vlgmr.msra.gmra.mrb[0].mxu1 %v208_v50 }
  0x7f   : > { %318 = vmatprep.mubr.f32.mxu0 %v858_v0  ;;  %366 = vmatprep.mubr.f32.mxu1 %v858_v0 }
  0x82   : > { %319 = vmatmul.mubr.f32.gmra.mrb[2].mxu0 %v201_v51  ;;  %367 = vmatmul.mubr.f32.gmra.mrb[2].mxu1 %v209_v52 }
  0x83   : > { %324 = vmatprep.mubr.f32.mxu0 %v858_v0  ;;  %372 = vmatprep.mubr.f32.mxu1 %v858_v0 }
  0x86   : > { %325 = vmatmul.mubr.f32.gmra.mrb[4].mxu0 %v202_v53  ;;  %373 = vmatmul.mubr.f32.gmra.mrb[4].mxu1 %v210_v54 }
  0x87   : > { %330 = vmatprep.mubr.f32.mxu0 %v858_v0  ;;  %378 = vmatprep.mubr.f32.mxu1 %v858_v0 }
  0x8a   : > { %331 = vmatmul.mubr.f32.gmra.mrb[6].mxu0 %v203_v55  ;;  %379 = vmatmul.mubr.f32.gmra.mrb[6].mxu1 %v211_v56 }
  0x8b   : > { %336 = vmatprep.mubr.f32.mxu0 %v858_v0  ;;  %384 = vmatprep.mubr.f32.mxu1 %v858_v0 }
  0x8e   : > { %337 = vmatmul.mubr.f32.gmra.mrb[8].mxu0 %v204_v57  ;;  %385 = vmatmul.mubr.f32.gmra.mrb[8].mxu1 %v212_v58 }
  0x8f   : > { %342 = vmatprep.mubr.f32.mxu0 %v858_v0  ;;  %390 = vmatprep.mubr.f32.mxu1 %v858_v0 }
  0x92   : > { %343 = vmatmul.mubr.f32.gmra.mrb[10].mxu0 %v205_v59  ;;  %391 = vmatmul.mubr.f32.gmra.mrb[10].mxu1 %v213_v60 }
  0x93   : > { %348 = vmatprep.mubr.f32.mxu0 %v858_v0  ;;  %396 = vmatprep.mubr.f32.mxu1 %v858_v0 }
  0x96   : > { %349 = vmatmul.mubr.f32.gmra.mrb[12].mxu0 %v206_v61  ;;  %397 = vmatmul.mubr.f32.gmra.mrb[12].mxu1 %v214_v62 }
  0x97   : > { %354 = vmatprep.mubr.f32.mxu0 %v858_v0  ;;  %402 = vmatprep.mubr.f32.mxu1 %v858_v0 }
  0x9a   : > { %355 = vmatmul.mubr.f32.gmra.mrb[14].mxu0 %v207_v63  ;;  %403 = vmatmul.mubr.f32.gmra.mrb[14].mxu1 %v215_v1 }
 0x151   : > { %v314_v2 = vpop.f32.mrb[0].mxu0  ;;  %v362_v3 = vpop.f32.mrb[0].mxu1 }
 0x152   : > { %409 = vst [vmem:[%s1095_s17] sm:$0xff] %v314_v2  ;;  %425 = vst [vmem:[%s1095_s17 + $0x80] sm:$0xff] %v362_v3  ;;  %v316_v0 = vpop.f32.mrb[1].mxu0  ;;  %v364_v4 = vpop.f32.mrb[1].mxu1 }
 0x153   : > { %410 = vst [vmem:[%s1095_s17 + $0x8] sm:$0xff] %v316_v0  ;;  %426 = vst [vmem:[%s1095_s17 + $0x88] sm:$0xff] %v364_v4 }
 0x155   : > { %v320_v5 = vpop.f32.mrb[2].mxu0  ;;  %v368_v6 = vpop.f32.mrb[2].mxu1 }
 0x156   : > { %411 = vst [vmem:[%s1095_s17 + $0x10] sm:$0xff] %v320_v5  ;;  %427 = vst [vmem:[%s1095_s17 + $0x90] sm:$0xff] %v368_v6  ;;  %v322_v7 = vpop.f32.mrb[3].mxu0  ;;  %v370_v8 = vpop.f32.mrb[3].mxu1 }
 0x157   : > { %412 = vst [vmem:[%s1095_s17 + $0x18] sm:$0xff] %v322_v7  ;;  %428 = vst [vmem:[%s1095_s17 + $0x98] sm:$0xff] %v370_v8 }
 0x159   : > { %v326_v9 = vpop.f32.mrb[4].mxu0  ;;  %v374_v10 = vpop.f32.mrb[4].mxu1 }
 0x15a   : > { %413 = vst [vmem:[%s1095_s17 + $0x20] sm:$0xff] %v326_v9  ;;  %429 = vst [vmem:[%s1095_s17 + $0xa0] sm:$0xff] %v374_v10  ;;  %v328_v11 = vpop.f32.mrb[5].mxu0  ;;  %v376_v12 = vpop.f32.mrb[5].mxu1 }
 0x15b   : > { %414 = vst [vmem:[%s1095_s17 + $0x28] sm:$0xff] %v328_v11  ;;  %430 = vst [vmem:[%s1095_s17 + $0xa8] sm:$0xff] %v376_v12 }
 0x15d   : > { %v332_v13 = vpop.f32.mrb[6].mxu0  ;;  %v380_v14 = vpop.f32.mrb[6].mxu1 }
 0x15e   : > { %415 = vst [vmem:[%s1095_s17 + $0x30] sm:$0xff] %v332_v13  ;;  %431 = vst [vmem:[%s1095_s17 + $0xb0] sm:$0xff] %v380_v14  ;;  %v334_v15 = vpop.f32.mrb[7].mxu0  ;;  %v382_v16 = vpop.f32.mrb[7].mxu1 }
 0x15f   : > { %416 = vst [vmem:[%s1095_s17 + $0x38] sm:$0xff] %v334_v15  ;;  %432 = vst [vmem:[%s1095_s17 + $0xb8] sm:$0xff] %v382_v16 }
 0x161   : > { %v338_v17 = vpop.f32.mrb[8].mxu0  ;;  %v386_v18 = vpop.f32.mrb[8].mxu1 }
 0x162   : > { %417 = vst [vmem:[%s1095_s17 + $0x40] sm:$0xff] %v338_v17  ;;  %433 = vst [vmem:[%s1095_s17 + $0xc0] sm:$0xff] %v386_v18  ;;  %v340_v19 = vpop.f32.mrb[9].mxu0  ;;  %v388_v20 = vpop.f32.mrb[9].mxu1 }
 0x163   : > { %418 = vst [vmem:[%s1095_s17 + $0x48] sm:$0xff] %v340_v19  ;;  %434 = vst [vmem:[%s1095_s17 + $0xc8] sm:$0xff] %v388_v20 }
 0x165   : > { %v344_v21 = vpop.f32.mrb[10].mxu0  ;;  %v392_v22 = vpop.f32.mrb[10].mxu1 }
 0x166   : > { %419 = vst [vmem:[%s1095_s17 + $0x50] sm:$0xff] %v344_v21  ;;  %435 = vst [vmem:[%s1095_s17 + $0xd0] sm:$0xff] %v392_v22  ;;  %v346_v23 = vpop.f32.mrb[11].mxu0  ;;  %v394_v24 = vpop.f32.mrb[11].mxu1 }
 0x167   : > { %420 = vst [vmem:[%s1095_s17 + $0x58] sm:$0xff] %v346_v23  ;;  %436 = vst [vmem:[%s1095_s17 + $0xd8] sm:$0xff] %v394_v24 }
 0x169   : > { %v350_v25 = vpop.f32.mrb[12].mxu0  ;;  %v398_v26 = vpop.f32.mrb[12].mxu1 }
 0x16a   : > { %421 = vst [vmem:[%s1095_s17 + $0x60] sm:$0xff] %v350_v25  ;;  %437 = vst [vmem:[%s1095_s17 + $0xe0] sm:$0xff] %v398_v26  ;;  %v352_v27 = vpop.f32.mrb[13].mxu0  ;;  %v400_v28 = vpop.f32.mrb[13].mxu1 }
 0x16b   : > { %422 = vst [vmem:[%s1095_s17 + $0x68] sm:$0xff] %v352_v27  ;;  %438 = vst [vmem:[%s1095_s17 + $0xe8] sm:$0xff] %v400_v28 }
 0x16d   : > { %v356_v29 = vpop.f32.mrb[14].mxu0  ;;  %v404_v30 = vpop.f32.mrb[14].mxu1 }
 0x16e   : > { %423 = vst [vmem:[%s1095_s17 + $0x70] sm:$0xff] %v356_v29  ;;  %439 = vst [vmem:[%s1095_s17 + $0xf0] sm:$0xff] %v404_v30  ;;  %v358_v31 = vpop.f32.mrb[15].mxu0  ;;  %v406_v32 = vpop.f32.mrb[15].mxu1 }
 0x16f   : > { %424 = vst [vmem:[%s1095_s17 + $0x78] sm:$0xff] %v358_v31  ;;  %440 = vst [vmem:[%s1095_s17 + $0xf8] sm:$0xff] %v406_v32 }
 0x170   : > { %777 = shalt.err (!%p774_p5)
}
 0x171   : > { %s778_s30 = scalar_lea.hbm %s1130_s6, 4096  ;;  %s782_s8 = scalar_lea.hbm %s1187_s2, 8192 }
 0x172   : > { %p779_p9 = scmp.ne.s32.totalorder %s1130_s6, %s778_s30  ;;  %p783_p3 = scmp.lt.u32.totalorder %s1130_s6, %s1187_s2 }
 0x173   : > { %p784_p7 = scmp.lt.u32.totalorder %s782_s8, %s778_s30  ;;  %p786_p4 = scmp.lt.u32.totalorder %s778_s30, %s1130_s6 }
 0x174   : > { %p780_p1 = pnand %p779_p9, %p973_p10 }
 0x175   : > { %p785_p13 = por %p784_p7, %p783_p3 }
 0x176   : > { %p781_p2 = pneg %p780_p1 }
 0x177   : > { %p787_p6 = por %p786_p4, %p785_p13 }
 0x179   : > { %p788_p8 = pnand %p787_p6, %p781_p2 }
 0x17b   : > { %791 = shalt.err (!%p788_p8)
}
 0x17c   : > { %s860_s24 = smov 256   ;;  %s861_s17 = smov 16  }
 0x17d   : > { %632 = dma.vmem_to_hbm [thread:$0]  (%p973_p10), %s1132_s21, 4096, %s1130_s6, %s442_s12, %s860_s24, %s860_s24, %s861_s17  }
 0x17e PF: > { %s473_s19 = sand.u32 1, %s830_s9   ;;  %p1205_p12 = scmp.ne.s32.totalorder %s1195_s20, 0 }
 0x17f   : > { %p1206_p11 = scmp.ge.s32.totalorder %s850_s14, 2  ;;  %s474_s4 = scalar_lea.sflag [#allocation4], %s473_s19 }
 0x181   : > { %p643_p0 = pnand %p1206_p11, %p1205_p12 }
 0x183   : > { %825 = dma.done.wait (!%p643_p0), %s474_s4, 4096  }
 0x184   : > { %827 = vsyncadd (!%p643_p0), %s474_s4, 4294963200  ;;  %s19_s14 = sadd.s32 1, %s850_s14   ;;  %s1207_s9 = smov %s834_s10 }
 0x185   : > { %p16_p5 = scmp.ge.s32.totalorder %s19_s14, 4   ;;  %s1208_s10 = smov %s838_s11 }
 0x186   : > { %s1209_s11 = smov %s982_s28  ;;  %s1210_s12 = smov %s846_s13 }
 0x187   : > { %s1211_s13 = smov %s1213_s25  ;;  %18 = sbr.rel (!%p16_p5) target bundleno = 7 (0x7), region = 77 }
 0x18e   :  { %479 = vsyncpa [#allocation3], 1 }
 0x18f   :  { %481 = vsyncpa [#allocation3 + $0x1], 1 }
 0x190   :  { %482 = vsyncpa [#allocation6], 1 }
 0x191   :  { %483 = vsyncpa [#allocation4], 1 }
 0x192   :  { %485 = vsyncpa [#allocation4 + $0x1], 1 }

</bundles_post_ra>
